<compile_context>
chip_gen: v6e
topology: v6e:2x2x1
jax: 0.10.0
libtpu: 0.0.40
codegen_flags: <defaults>
</compile_context>

<pallas_src>
import math

import jax
import jax.numpy as jnp
from jax.experimental import pallas as pl
from jax.experimental.pallas import tpu as pltpu

NUM_HEADS = 4
DIM = 32
DH = DIM // NUM_HEADS          # Dh per head
ATTEN = NUM_HEADS * DH         # == DIM


def _group_reduce(x, op, n_members, stride):
    """Reduce over the n_members of every stride-`stride` residue class of the
    lane axis (lane extent == n_members * stride) using circular rolls."""
    if n_members & (n_members - 1) == 0:        # power of two -> log2 tree
        shift = stride
        while shift < n_members * stride:
            x = op(x, pltpu.roll(x, shift, axis=1))
            shift *= 2
        return x
    acc, cur = x, x
    for _ in range(n_members - 1):              # general case: sequential
        cur = pltpu.roll(cur, stride, axis=1)
        acc = op(acc, cur)
    return acc


def temporal_kernel(x_ref, wf_ref, bf_ref, s_ref, wo_ref, bo_ref, out_ref):
    """One grid step handles one batch tile.

    x_ref  : (Bt, L*D)          lane-dense input slab
    wf_ref : (L*D, 3*L*ATTEN)   fused [q_tiled*scale | k<-Wv blockdiag | v<-Wk blockdiag]
    bf_ref : (1, 3*L*ATTEN)
    s_ref  : (L*ATTEN, L*ATTEN) per-(l, head) group selector (block-diag of ones)
    wo_ref : (L*ATTEN, D)       Wo tiled L times,  bo_ref: (1, D)
    out_ref: (Bt, D)
    """
    LA = wf_ref.shape[1] // 3          # L * ATTEN
    L = LA // ATTEN

    # ---- fused projection: one wide, dense MXU matmul ----
    proj = jnp.dot(x_ref[...], wf_ref[...],
                   preferred_element_type=jnp.float32) + bf_ref[...]
    q_t = proj[:, 0:LA]                # q(last step), pre-scaled, tiled over l
    k_f = proj[:, LA:2 * LA]           # (Bt, L*ATTEN)  <- v-projection (quirk)
    v_f = proj[:, 2 * LA:3 * LA]       # (Bt, L*ATTEN)  <- k-projection (quirk)

    # ---- per-head scores: sum over the Dh lanes of each (l, head) group ----
    prod = q_t * k_f                                           # (Bt, L*ATTEN)
    seg = jnp.dot(prod, s_ref[...],
                  preferred_element_type=jnp.float32)          # score(b,h,l) repl. per lane

    # ---- stable softmax over the L keys (lane residue classes mod ATTEN) ----
    m = _group_reduce(seg, jnp.maximum, L, ATTEN)
    e = jnp.exp(seg - m)
    den = _group_reduce(e, jnp.add, L, ATTEN)
    w = e / den                                                # (Bt, L*ATTEN)

    # ---- head merge + output projection fused into one matmul ----
    out = jnp.dot(w * v_f, wo_ref[...],
                  preferred_element_type=jnp.float32) + bo_ref[...]
    out_ref[...] = out.astype(out_ref.dtype)


def pack_params(params, seq_len):
    """One-time parameter prep: block-diagonal fused projection weights,
    score scale folded into q, head-group selector, tiled output projection."""
    wq, bq, wk, bk, wv, bv, wo, bo = params
    L, D, A = seq_len, DIM, ATTEN
    LD, LA = L * D, L * A
    scale = 1.0 / math.sqrt(DH * NUM_HEADS)          # == 1/sqrt(dim)

    def blockdiag(w):                                # (D, A) -> (L*D, L*A)
        return jnp.einsum('ij,dk->idjk', jnp.eye(L, dtype=w.dtype),
                          w).reshape(LD, LA)

    # q: only from last timestep, replicated across the L column blocks.
    wq_blk = jnp.zeros((LD, LA), jnp.float32)
    wq_blk = wq_blk.at[(L - 1) * D:L * D, :].set(jnp.tile(wq * scale, (1, L)))
    bq_t = jnp.tile(bq * scale, (1, L))
    # order [q | v-linear | k-linear] keeps the reference's k_mat<-v / v_mat<-k swap.
    w_fused = jnp.concatenate([wq_blk, blockdiag(wv), blockdiag(wk)], axis=1)
    b_fused = jnp.concatenate([bq_t, jnp.tile(bv, (1, L)),
                               jnp.tile(bk, (1, L))], axis=1)

    grp = jnp.arange(LA) // DH                       # same (l, head) group
    sel = (grp[:, None] == grp[None, :]).astype(jnp.float32)   # (LA, LA)

    wo_t = jnp.tile(wo, (L, 1))                      # (L*A, D)
    return (w_fused, b_fused, sel, wo_t, bo)


def temporal_forward(x, packed, *, batch_tile=512):
    """x: (B, L, D) f32 -> (B, 1, D) f32."""
    w_fused, b_fused, sel, wo_t, bo = packed
    B, L, D = x.shape
    LD = L * D

    xf = x.reshape(B, LD)                            # lane-dense input slab
    Bt = B if B <= batch_tile else batch_tile
    n_blocks = -(-B // Bt)
    Bp = n_blocks * Bt
    xp = xf if Bp == B else jnp.pad(xf, ((0, Bp - B), (0, 0)))

    def full(a):
        return pl.BlockSpec(a.shape, lambda i: (0,) * a.ndim)

    LA = w_fused.shape[1] // 3
    flops = int(Bp * (2 * LD * 3 * LA       # fused projection
                      + 2 * LA * LA         # group-selector matmul
                      + 2 * LA * D          # head-merge + output projection
                      + 12 * LA))           # elementwise / softmax / rolls
    transcendentals = int(Bp * LA)
    bytes_accessed = int(xp.size * 4 + Bp * D * 4
                         + 4 * (w_fused.size + b_fused.size + sel.size
                                + wo_t.size + bo.size))

    out = pl.pallas_call(
        temporal_kernel,
        out_shape=jax.ShapeDtypeStruct((Bp, D), x.dtype),
        grid=(n_blocks,),
        in_specs=[
            pl.BlockSpec((Bt, LD), lambda i: (i, 0)),
            full(w_fused), full(b_fused), full(sel), full(wo_t), full(bo),
        ],
        out_specs=pl.BlockSpec((Bt, D), lambda i: (i, 0)),
        compiler_params=pltpu.CompilerParams(dimension_semantics=("parallel",)),
        cost_estimate=pl.CostEstimate(flops=flops,
                                      transcendentals=transcendentals,
                                      bytes_accessed=bytes_accessed),
    )(xp, w_fused, b_fused, sel, wo_t, bo)

    return out[:B].reshape(B, 1, D)


def temporal_reference(x, params):
    """Pure-JAX reference mirroring the PyTorch forward exactly."""
    wq, bq, wk, bk, wv, bv, wo, bo = params
    B, L, D = x.shape
    q = x[:, L - 1, :] @ wq + bq[0]                       # (B, ATTEN)
    k_mat = x @ wv + bv[0]                                # (B, L, ATTEN)  (v-proj!)
    v_mat = x @ wk + bk[0]                                # (B, L, ATTEN)  (k-proj!)
    q = q.reshape(B, 1, NUM_HEADS, DH).transpose(0, 2, 1, 3)       # (B,H,1,Dh)
    k_mat = k_mat.reshape(B, L, NUM_HEADS, DH).transpose(0, 2, 1, 3)
    v_mat = v_mat.reshape(B, L, NUM_HEADS, DH).transpose(0, 2, 1, 3)
    scores = jnp.einsum('bhqd,bhkd->bhqk', q, k_mat) / math.sqrt(DH * NUM_HEADS)
    w = jax.nn.softmax(scores, axis=-1)
    inter = jnp.einsum('bhqk,bhkd->bhqd', w, v_mat)
    inter = inter.transpose(0, 2, 1, 3).reshape(B, 1, D)
    return inter @ wo + bo[0]


def init_params(key, dim, atten):
    ks = jax.random.split(key, 8)
    s_in = 1.0 / math.sqrt(dim)
    s_att = 1.0 / math.sqrt(atten)
    wq = jax.random.uniform(ks[0], (dim, atten), jnp.float32, -s_in, s_in)
    bq = jax.random.uniform(ks[1], (1, atten), jnp.float32, -s_in, s_in)
    wk = jax.random.uniform(ks[2], (dim, atten), jnp.float32, -s_in, s_in)
    bk = jax.random.uniform(ks[3], (1, atten), jnp.float32, -s_in, s_in)
    wv = jax.random.uniform(ks[4], (dim, atten), jnp.float32, -s_in, s_in)
    bv = jax.random.uniform(ks[5], (1, atten), jnp.float32, -s_in, s_in)
    wo = jax.random.uniform(ks[6], (atten, dim), jnp.float32, -s_att, s_att)
    bo = jax.random.uniform(ks[7], (1, dim), jnp.float32, -s_att, s_att)
    return (wq, bq, wk, bk, wv, bv, wo, bo)


if __name__ == "__main__":
    B, L = 2, 8
    key = jax.random.PRNGKey(0)
    k_x, k_p = jax.random.split(key)
    x = jax.random.normal(k_x, (B, L, DIM), jnp.float32)
    params = init_params(k_p, DIM, ATTEN)
    packed = pack_params(params, L)

    out = temporal_forward(x, packed)
    out = jax.block_until_ready(out)

    ref = temporal_reference(x, params)
    assert out.shape == (B, 1, DIM), out.shape
    assert jnp.allclose(out, ref, atol=1e-4, rtol=1e-4), float(
        jnp.max(jnp.abs(out - ref)))

    print("KERNEL_OK")
</pallas_src>

<mosaic_0001>
module attributes {stable_mosaic.version = 11 : i64} {
  func.func @temporal_kernel(%arg0: i32, %arg1: memref<2x256xf32, #tpu.memory_space<vmem>>, %arg2: memref<256x768xf32, #tpu.memory_space<vmem>>, %arg3: memref<1x768xf32, #tpu.memory_space<vmem>>, %arg4: memref<256x256xf32, #tpu.memory_space<vmem>>, %arg5: memref<256x32xf32, #tpu.memory_space<vmem>>, %arg6: memref<1x32xf32, #tpu.memory_space<vmem>>, %arg7: memref<2x32xf32, #tpu.memory_space<vmem>>) attributes {dimension_semantics = [#tpu.dimension_semantics<parallel>], iteration_bounds = array<i64: 1>, scalar_prefetch = 0 : i64, scratch_operands = 0 : i64, tpu.core_type = #tpu.core_type<tc>, window_params = [{transform_indices = @transform_0, window_bounds = array<i64: 2, 256>}, {pipeline_mode = #tpu.pipeline_mode<synchronous>, transform_indices = @transform_1, window_bounds = array<i64: 256, 768>}, {pipeline_mode = #tpu.pipeline_mode<synchronous>, transform_indices = @transform_2, window_bounds = array<i64: 1, 768>}, {pipeline_mode = #tpu.pipeline_mode<synchronous>, transform_indices = @transform_3, window_bounds = array<i64: 256, 256>}, {pipeline_mode = #tpu.pipeline_mode<synchronous>, transform_indices = @transform_4, window_bounds = array<i64: 256, 32>}, {pipeline_mode = #tpu.pipeline_mode<synchronous>, transform_indices = @transform_5, window_bounds = array<i64: 1, 32>}, {transform_indices = @transform_6, window_bounds = array<i64: 2, 32>}]} {
    %c0 = arith.constant 0 : index
    %c0_0 = arith.constant 0 : index
    %0 = vector.load %arg1[%c0, %c0_0] : memref<2x256xf32, #tpu.memory_space<vmem>>, vector<2x256xf32>
    %c0_1 = arith.constant 0 : index
    %c0_2 = arith.constant 0 : index
    %1 = vector.load %arg2[%c0_1, %c0_2] : memref<256x768xf32, #tpu.memory_space<vmem>>, vector<256x768xf32>
    %cst = arith.constant dense<0.000000e+00> : vector<2x768xf32>
    %2 = tpu.matmul %0, %1, %cst {dimension_numbers = #tpu.dot_dimension_numbers<[1], [0], [0], [1], [0, 0, 1, 1], [], []>} : vector<2x256xf32>, vector<256x768xf32>, vector<2x768xf32> -> vector<2x768xf32>
    %c0_3 = arith.constant 0 : index
    %c0_4 = arith.constant 0 : index
    %3 = vector.load %arg3[%c0_3, %c0_4] : memref<1x768xf32, #tpu.memory_space<vmem>>, vector<1x768xf32>
    %4 = vector.broadcast %3 : vector<1x768xf32> to vector<2x768xf32>
    %5 = arith.addf %2, %4 : vector<2x768xf32>
    %6 = vector.extract_strided_slice %5 {offsets = [0, 0], sizes = [2, 256], strides = [1, 1]} : vector<2x768xf32> to vector<2x256xf32>
    %7 = vector.extract_strided_slice %5 {offsets = [0, 256], sizes = [2, 256], strides = [1, 1]} : vector<2x768xf32> to vector<2x256xf32>
    %8 = vector.extract_strided_slice %5 {offsets = [0, 512], sizes = [2, 256], strides = [1, 1]} : vector<2x768xf32> to vector<2x256xf32>
    %9 = arith.mulf %6, %7 : vector<2x256xf32>
    %c0_5 = arith.constant 0 : index
    %c0_6 = arith.constant 0 : index
    %10 = vector.load %arg4[%c0_5, %c0_6] : memref<256x256xf32, #tpu.memory_space<vmem>>, vector<256x256xf32>
    %cst_7 = arith.constant dense<0.000000e+00> : vector<2x256xf32>
    %11 = tpu.matmul %9, %10, %cst_7 {dimension_numbers = #tpu.dot_dimension_numbers<[1], [0], [0], [1], [0, 0, 1, 1], [], []>} : vector<2x256xf32>, vector<256x256xf32>, vector<2x256xf32> -> vector<2x256xf32>
    %c32_i32 = arith.constant 32 : i32
    %12 = tpu.dynamic_rotate %11 by %c32_i32 dim 1 : vector<2x256xf32>, i32 -> vector<2x256xf32>
    %13 = arith.maximumf %11, %12 : vector<2x256xf32>
    %c64_i32 = arith.constant 64 : i32
    %14 = tpu.dynamic_rotate %13 by %c64_i32 dim 1 : vector<2x256xf32>, i32 -> vector<2x256xf32>
    %15 = arith.maximumf %13, %14 : vector<2x256xf32>
    %c128_i32 = arith.constant 128 : i32
    %16 = tpu.dynamic_rotate %15 by %c128_i32 dim 1 : vector<2x256xf32>, i32 -> vector<2x256xf32>
    %17 = arith.maximumf %15, %16 : vector<2x256xf32>
    %18 = arith.subf %11, %17 : vector<2x256xf32>
    %19 = math.exp %18 : vector<2x256xf32>
    %c32_i32_8 = arith.constant 32 : i32
    %20 = tpu.dynamic_rotate %19 by %c32_i32_8 dim 1 : vector<2x256xf32>, i32 -> vector<2x256xf32>
    %21 = arith.addf %19, %20 : vector<2x256xf32>
    %c64_i32_9 = arith.constant 64 : i32
    %22 = tpu.dynamic_rotate %21 by %c64_i32_9 dim 1 : vector<2x256xf32>, i32 -> vector<2x256xf32>
    %23 = arith.addf %21, %22 : vector<2x256xf32>
    %c128_i32_10 = arith.constant 128 : i32
    %24 = tpu.dynamic_rotate %23 by %c128_i32_10 dim 1 : vector<2x256xf32>, i32 -> vector<2x256xf32>
    %25 = arith.addf %23, %24 : vector<2x256xf32>
    %26 = arith.divf %19, %25 : vector<2x256xf32>
    %27 = arith.mulf %26, %8 : vector<2x256xf32>
    %c0_11 = arith.constant 0 : index
    %c0_12 = arith.constant 0 : index
    %28 = vector.load %arg5[%c0_11, %c0_12] : memref<256x32xf32, #tpu.memory_space<vmem>>, vector<256x32xf32>
    %cst_13 = arith.constant dense<0.000000e+00> : vector<2x32xf32>
    %29 = tpu.matmul %27, %28, %cst_13 {dimension_numbers = #tpu.dot_dimension_numbers<[1], [0], [0], [1], [0, 0, 1, 1], [], []>} : vector<2x256xf32>, vector<256x32xf32>, vector<2x32xf32> -> vector<2x32xf32>
    %c0_14 = arith.constant 0 : index
    %c0_15 = arith.constant 0 : index
    %30 = vector.load %arg6[%c0_14, %c0_15] : memref<1x32xf32, #tpu.memory_space<vmem>>, vector<1x32xf32>
    %31 = vector.broadcast %30 : vector<1x32xf32> to vector<2x32xf32>
    %32 = arith.addf %29, %31 : vector<2x32xf32>
    %c0_16 = arith.constant 0 : index
    %c0_17 = arith.constant 0 : index
    %33 = vector.load %arg7[%c0_16, %c0_17] : memref<2x32xf32, #tpu.memory_space<vmem>>, vector<2x32xf32>
    tpu.vector_store %arg7[%c0_16, %c0_17], %32 {strides = array<i32>} : memref<2x32xf32, #tpu.memory_space<vmem>>, vector<2x32xf32>,
    return
  }
  func.func @transform_0(%arg0: i32) -> (i32, i32) {
    %c0_i32 = arith.constant 0 : i32
    %c0_i32_0 = arith.constant 0 : i32
    return %arg0, %c0_i32 : i32, i32
  }
  func.func @transform_1(%arg0: i32) -> (i32, i32) {
    %c0_i32 = arith.constant 0 : i32
    %c0_i32_0 = arith.constant 0 : i32
    %c0_i32_1 = arith.constant 0 : i32
    return %c0_i32, %c0_i32_0 : i32, i32
  }
  func.func @transform_2(%arg0: i32) -> (i32, i32) {
    %c0_i32 = arith.constant 0 : i32
    %c0_i32_0 = arith.constant 0 : i32
    %c0_i32_1 = arith.constant 0 : i32
    return %c0_i32, %c0_i32_0 : i32, i32
  }
  func.func @transform_3(%arg0: i32) -> (i32, i32) {
    %c0_i32 = arith.constant 0 : i32
    %c0_i32_0 = arith.constant 0 : i32
    %c0_i32_1 = arith.constant 0 : i32
    return %c0_i32, %c0_i32_0 : i32, i32
  }
  func.func @transform_4(%arg0: i32) -> (i32, i32) {
    %c0_i32 = arith.constant 0 : i32
    %c0_i32_0 = arith.constant 0 : i32
    %c0_i32_1 = arith.constant 0 : i32
    return %c0_i32, %c0_i32_0 : i32, i32
  }
  func.func @transform_5(%arg0: i32) -> (i32, i32) {
    %c0_i32 = arith.constant 0 : i32
    %c0_i32_0 = arith.constant 0 : i32
    %c0_i32_1 = arith.constant 0 : i32
    return %c0_i32, %c0_i32_0 : i32, i32
  }
  func.func @transform_6(%arg0: i32) -> (i32, i32) {
    %c0_i32 = arith.constant 0 : i32
    %c0_i32_0 = arith.constant 0 : i32
    return %arg0, %c0_i32 : i32, i32
  }
}

</mosaic_0001>

<bundles_post_ra>
// kernel: tpu_custom_call.1
= control target key start
LH: loop header
LB: loop body
LE: loop exit
PB: predicated region body
PF: predicated region fallthrough
CT: control target
= control target key end

     0   :  { %11 = vsyncpa [#allocation3], 0  ;;  %s1169_s0 = inlined_call_operand.vmem [shape: f32[2,256], index: 0, kind: input, shape index: {}]   ;;  %s1170_s1 = inlined_call_operand.hbm [shape: f32[256,768], index: 1, kind: input, shape index: {}]   ;;  %s1171_s2 = inlined_call_operand.vmem [shape: f32[1,768], index: 2, kind: input, shape index: {}]   ;;  %s1172_s3 = inlined_call_operand.hbm [shape: f32[256,256], index: 3, kind: input, shape index: {}]   ;;  %s1173_s4 = inlined_call_operand.vmem [shape: f32[256,32], index: 4, kind: input, shape index: {}]   ;;  %s1174_s5 = inlined_call_operand.vmem [shape: f32[1,32], index: 5, kind: input, shape index: {}]   ;;  %s1175_s6 = inlined_call_operand.hbm [shape: f32[2,32], index: 6, kind: output, shape index: {}]  }
   0x1   :  { %12 = vsyncpa [#allocation6], 0 }
   0x2   :  { %13 = vsyncpa [#allocation4], 0  ;;  %s932_s21 = smov [#allocation2]  }
   0x3   :  { %s21_s22 = sshll.u32 %s932_s21, 4  ;;  %s22_s22 = int_to_ptr.vmem [resolvable:$true] %s21_s22 }
   0x4   :  { %s874_s23 = scalar_lea.vmem %s22_s22, 24576  ;;  %p879_p1 = scmp.lt.s32.totalorder %s22_s22, %s22_s22 }
   0x5   :  { %p875_p0 = scmp.ne.s32.totalorder %s22_s22, %s874_s23  ;;  %p880_p2 = scmp.lt.s32.totalorder %s874_s23, %s874_s23 }
   0x7   :  { %p881_p3 = por %p880_p2, %p879_p1 }
   0x9   :  { %p882_p4 = pnand %p881_p3, %p875_p0 }
   0xb   :  { %885 = shalt.err (!%p882_p4)
}
   0xc   :  { %s933_s24 = smov 768   ;;  %s934_s25 = smov 48  }
   0xd   :  { %27 = dma.hbm_to_vmem [thread:$0]  %s1170_s1, 24576, %s22_s22, [#allocation3], %s933_s24, %s933_s24, %s934_s25  }
   0xe   :  { %s935_s28 = smov [#allocation5]  }
   0xf   :  { %s35_s29 = sshll.u32 %s935_s28, 4  ;;  %s36_s29 = int_to_ptr.vmem [resolvable:$true] %s35_s29 }
  0x10   :  { %s894_s30 = scalar_lea.vmem %s36_s29, 8192  ;;  %p899_p6 = scmp.lt.s32.totalorder %s36_s29, %s36_s29 }
  0x11   :  { %p895_p5 = scmp.ne.s32.totalorder %s36_s29, %s894_s30  ;;  %p900_p7 = scmp.lt.s32.totalorder %s894_s30, %s894_s30 }
  0x13   :  { %p901_p8 = por %p900_p7, %p899_p6 }
  0x15   :  { %p902_p9 = pnand %p901_p8, %p895_p5 }
  0x17   :  { %905 = shalt.err (!%p902_p9)
}
  0x18   :  { %s936_s7 = smov 256   ;;  %s937_s8 = smov 16  }
  0x19   :  { %41 = dma.hbm_to_vmem [thread:$0]  %s1172_s3, 8192, %s36_s29, [#allocation6], %s936_s7, %s936_s7, %s937_s8  }
  0x1a   :  { %926 = dma.done.wait [#allocation3], 24576  }
  0x1b   :  { %927 = vsyncadd [#allocation3], 4294942720 }
  0x1c   :  { %928 = dma.done.wait [#allocation6], 8192  }
  0x1d   :  { %929 = vsyncadd [#allocation6], 4294959104  ;;  %v144_v0 = vld [vmem:[#allocation2 + $0x2d8] sm:$0xff]  ;;  %v146_v1 = vld [vmem:[#allocation2 + $0x2e8] sm:$0xff]  ;;  %s939_s12 = smov 64   ;;  %s940_s23 = smov [#allocation7]  }
  0x1e   :  { %v143_v2 = vld [vmem:[#allocation2 + $0x2d0] sm:$0xff]  ;;  %288 = vmatprep.subr.mxu0 %v144_v0  ;;  %359 = vmatprep.subr.mxu1 %v146_v1  ;;  %v145_v3 = vld [vmem:[#allocation2 + $0x2e0] sm:$0xff]  ;;  %v138_v4 = vld [vmem:[#allocation2 + $0x2a8] sm:$0xff]  ;;  %s804_s24 = sshll.u32 %s940_s23, 4  ;;  %vm796_vm2 = vcmask 254976   ;;  %s805_s24 = int_to_ptr.vmem [resolvable:$true] %s804_s24 }
  0x1f   :  { %v140_v5 = vld [vmem:[#allocation2 + $0x2b8] sm:$0xff]  ;;  %289 = vmatpush1.msra.mxu0 %v143_v2  ;;  %360 = vmatpush1.msra.mxu1 %v145_v3  ;;  %v137_v6 = vld [vmem:[#allocation2 + $0x2a0] sm:$0xff]  ;;  %v139_v7 = vld [vmem:[#allocation2 + $0x2b0] sm:$0xff]  ;;  %s906_s25 = scalar_lea.vmem %s805_s24, 32  ;;  %p911_p11 = scmp.lt.s32.totalorder %s805_s24, %s805_s24 }
  0x20   :  { %v132_v8 = vld [vmem:[#allocation2 + $0x278] sm:$0xff]  ;;  %290 = vmatprep.subr.mxu0 %v138_v4  ;;  %361 = vmatprep.subr.mxu1 %v140_v5  ;;  %v134_v9 = vld [vmem:[#allocation2 + $0x288] sm:$0xff]  ;;  %v131_v10 = vld [vmem:[#allocation2 + $0x270] sm:$0xff]  ;;  %p907_p10 = scmp.ne.s32.totalorder %s805_s24, %s906_s25  ;;  %p912_p12 = scmp.lt.s32.totalorder %s906_s25, %s906_s25 }
  0x21   :  { %v133_v11 = vld [vmem:[#allocation2 + $0x280] sm:$0xff]  ;;  %291 = vmatpush1.msra.mxu0 %v137_v6  ;;  %362 = vmatpush1.msra.mxu1 %v139_v7  ;;  %v126_v12 = vld [vmem:[#allocation2 + $0x248] sm:$0xff]  ;;  %v128_v13 = vld [vmem:[#allocation2 + $0x258] sm:$0xff] }
  0x22   :  { %292 = vmatprep.subr.mxu0 %v132_v8  ;;  %363 = vmatprep.subr.mxu1 %v134_v9  ;;  %v125_v14 = vld [vmem:[#allocation2 + $0x240] sm:$0xff]  ;;  %v127_v15 = vld [vmem:[#allocation2 + $0x250] sm:$0xff]  ;;  %v120_v16 = vld [vmem:[#allocation2 + $0x218] sm:$0xff]  ;;  %p913_p13 = por %p912_p12, %p911_p11 }
  0x23   :  { %293 = vmatpush1.msra.mxu0 %v131_v10  ;;  %364 = vmatpush1.msra.mxu1 %v133_v11  ;;  %v122_v17 = vld [vmem:[#allocation2 + $0x228] sm:$0xff]  ;;  %v119_v18 = vld [vmem:[#allocation2 + $0x210] sm:$0xff]  ;;  %v121_v19 = vld [vmem:[#allocation2 + $0x220] sm:$0xff] }
  0x24   :  { %294 = vmatprep.subr.mxu0 %v126_v12  ;;  %365 = vmatprep.subr.mxu1 %v128_v13  ;;  %v114_v20 = vld [vmem:[#allocation2 + $0x1e8] sm:$0xff]  ;;  %v116_v21 = vld [vmem:[#allocation2 + $0x1f8] sm:$0xff]  ;;  %v113_v22 = vld [vmem:[#allocation2 + $0x1e0] sm:$0xff]  ;;  %p914_p0 = pnand %p913_p13, %p907_p10 }
  0x25   :  { %295 = vmatpush1.msra.mxu0 %v125_v14  ;;  %366 = vmatpush1.msra.mxu1 %v127_v15  ;;  %v115_v23 = vld [vmem:[#allocation2 + $0x1f0] sm:$0xff]  ;;  %v108_v24 = vld [vmem:[#allocation2 + $0x1b8] sm:$0xff]  ;;  %v110_v25 = vld [vmem:[#allocation2 + $0x1c8] sm:$0xff] }
  0x26   :  { %296 = vmatprep.subr.mxu0 %v120_v16  ;;  %367 = vmatprep.subr.mxu1 %v122_v17  ;;  %v107_v26 = vld [vmem:[#allocation2 + $0x1b0] sm:$0xff]  ;;  %v109_v27 = vld [vmem:[#allocation2 + $0x1c0] sm:$0xff]  ;;  %v102_v28 = vld [vmem:[#allocation2 + $0x188] sm:$0xff] }
  0x27   :  { %297 = vmatpush1.msra.mxu0 %v119_v18  ;;  %368 = vmatpush1.msra.mxu1 %v121_v19  ;;  %v104_v29 = vld [vmem:[#allocation2 + $0x198] sm:$0xff]  ;;  %v101_v30 = vld [vmem:[#allocation2 + $0x180] sm:$0xff]  ;;  %v103_v31 = vld [vmem:[#allocation2 + $0x190] sm:$0xff] }
  0x28   :  { %298 = vmatprep.subr.mxu0 %v114_v20  ;;  %369 = vmatprep.subr.mxu1 %v116_v21  ;;  %v96_v32 = vld [vmem:[#allocation2 + $0x158] sm:$0xff]  ;;  %v98_v33 = vld [vmem:[#allocation2 + $0x168] sm:$0xff]  ;;  %v95_v34 = vld [vmem:[#allocation2 + $0x150] sm:$0xff] }
  0x29   :  { %299 = vmatpush1.msra.mxu0 %v113_v22  ;;  %370 = vmatpush1.msra.mxu1 %v115_v23  ;;  %v97_v35 = vld [vmem:[#allocation2 + $0x160] sm:$0xff]  ;;  %v90_v36 = vld [vmem:[#allocation2 + $0x128] sm:$0xff]  ;;  %v92_v37 = vld [vmem:[#allocation2 + $0x138] sm:$0xff] }
  0x2a   :  { %300 = vmatprep.subr.mxu0 %v108_v24  ;;  %371 = vmatprep.subr.mxu1 %v110_v25  ;;  %v89_v38 = vld [vmem:[#allocation2 + $0x120] sm:$0xff]  ;;  %v91_v39 = vld [vmem:[#allocation2 + $0x130] sm:$0xff]  ;;  %v84_v40 = vld [vmem:[#allocation2 + $0xf8] sm:$0xff] }
  0x2b   :  { %301 = vmatpush1.msra.mxu0 %v107_v26  ;;  %372 = vmatpush1.msra.mxu1 %v109_v27  ;;  %v86_v41 = vld [vmem:[#allocation2 + $0x108] sm:$0xff]  ;;  %v83_v42 = vld [vmem:[#allocation2 + $0xf0] sm:$0xff]  ;;  %v85_v43 = vld [vmem:[#allocation2 + $0x100] sm:$0xff] }
  0x2c   :  { %302 = vmatprep.subr.mxu0 %v102_v28  ;;  %373 = vmatprep.subr.mxu1 %v104_v29  ;;  %v78_v44 = vld [vmem:[#allocation2 + $0xc8] sm:$0xff]  ;;  %v80_v45 = vld [vmem:[#allocation2 + $0xd8] sm:$0xff]  ;;  %v77_v46 = vld [vmem:[#allocation2 + $0xc0] sm:$0xff] }
  0x2d   :  { %303 = vmatpush1.msra.mxu0 %v101_v30  ;;  %374 = vmatpush1.msra.mxu1 %v103_v31  ;;  %v79_v47 = vld [vmem:[#allocation2 + $0xd0] sm:$0xff]  ;;  %v72_v48 = vld [vmem:[#allocation2 + $0x98] sm:$0xff]  ;;  %v74_v49 = vld [vmem:[#allocation2 + $0xa8] sm:$0xff] }
  0x2e   :  { %304 = vmatprep.subr.mxu0 %v96_v32  ;;  %375 = vmatprep.subr.mxu1 %v98_v33  ;;  %v71_v50 = vld [vmem:[#allocation2 + $0x90] sm:$0xff]  ;;  %v73_v51 = vld [vmem:[#allocation2 + $0xa0] sm:$0xff]  ;;  %v66_v52 = vld [vmem:[#allocation2 + $0x68] sm:$0xff] }
  0x2f   :  { %305 = vmatpush1.msra.mxu0 %v95_v34  ;;  %376 = vmatpush1.msra.mxu1 %v97_v35  ;;  %v68_v53 = vld [vmem:[#allocation2 + $0x78] sm:$0xff]  ;;  %v65_v54 = vld [vmem:[#allocation2 + $0x60] sm:$0xff]  ;;  %v67_v55 = vld [vmem:[#allocation2 + $0x70] sm:$0xff] }
  0x30   :  { %306 = vmatprep.subr.mxu0 %v90_v36  ;;  %377 = vmatprep.subr.mxu1 %v92_v37  ;;  %v60_v56 = vld [vmem:[#allocation2 + $0x38] sm:$0xff]  ;;  %v62_v57 = vld [vmem:[#allocation2 + $0x48] sm:$0xff]  ;;  %v59_v58 = vld [vmem:[#allocation2 + $0x30] sm:$0xff] }
  0x31   :  { %307 = vmatpush1.msra.mxu0 %v89_v38  ;;  %378 = vmatpush1.msra.mxu1 %v91_v39  ;;  %v61_v59 = vld [vmem:[#allocation2 + $0x40] sm:$0xff]  ;;  %v54_v60 = vld [vmem:[#allocation2 + $0x8] sm:$0xff]  ;;  %v56_v61 = vld [vmem:[#allocation2 + $0x18] sm:$0xff] }
  0x32   :  { %308 = vmatprep.subr.mxu0 %v84_v40  ;;  %379 = vmatprep.subr.mxu1 %v86_v41  ;;  %v53_v62 = vld [vmem:[#allocation2] sm:$0xff]  ;;  %v55_v63 = vld [vmem:[#allocation2 + $0x10] sm:$0xff]  ;;  %v240_v0 = vld [vmem:[#allocation2 + $0x5d8] sm:$0xff] }
  0x33   :  { %309 = vmatpush1.msra.mxu0 %v83_v42  ;;  %380 = vmatpush1.msra.mxu1 %v85_v43  ;;  %v242_v1 = vld [vmem:[#allocation2 + $0x5e8] sm:$0xff]  ;;  %v239_v2 = vld [vmem:[#allocation2 + $0x5d0] sm:$0xff]  ;;  %v241_v3 = vld [vmem:[#allocation2 + $0x5e0] sm:$0xff] }
  0x34   :  { %310 = vmatprep.subr.mxu0 %v78_v44  ;;  %381 = vmatprep.subr.mxu1 %v80_v45  ;;  %v234_v4 = vld [vmem:[#allocation2 + $0x5a8] sm:$0xff]  ;;  %v236_v5 = vld [vmem:[#allocation2 + $0x5b8] sm:$0xff]  ;;  %v233_v6 = vld [vmem:[#allocation2 + $0x5a0] sm:$0xff] }
  0x35   :  { %311 = vmatpush1.msra.mxu0 %v77_v46  ;;  %382 = vmatpush1.msra.mxu1 %v79_v47  ;;  %v235_v7 = vld [vmem:[#allocation2 + $0x5b0] sm:$0xff]  ;;  %v228_v8 = vld [vmem:[#allocation2 + $0x578] sm:$0xff]  ;;  %v230_v9 = vld [vmem:[#allocation2 + $0x588] sm:$0xff] }
  0x36   :  { %312 = vmatprep.subr.mxu0 %v72_v48  ;;  %383 = vmatprep.subr.mxu1 %v74_v49  ;;  %v227_v10 = vld [vmem:[#allocation2 + $0x570] sm:$0xff]  ;;  %v229_v11 = vld [vmem:[#allocation2 + $0x580] sm:$0xff]  ;;  %v222_v12 = vld [vmem:[#allocation2 + $0x548] sm:$0xff] }
  0x37   :  { %313 = vmatpush1.msra.mxu0 %v71_v50  ;;  %384 = vmatpush1.msra.mxu1 %v73_v51  ;;  %v224_v13 = vld [vmem:[#allocation2 + $0x558] sm:$0xff]  ;;  %v221_v14 = vld [vmem:[#allocation2 + $0x540] sm:$0xff]  ;;  %v223_v15 = vld [vmem:[#allocation2 + $0x550] sm:$0xff] }
  0x38   :  { %314 = vmatprep.subr.mxu0 %v66_v52  ;;  %385 = vmatprep.subr.mxu1 %v68_v53  ;;  %v216_v16 = vld [vmem:[#allocation2 + $0x518] sm:$0xff]  ;;  %v218_v17 = vld [vmem:[#allocation2 + $0x528] sm:$0xff]  ;;  %v215_v18 = vld [vmem:[#allocation2 + $0x510] sm:$0xff] }
  0x39   :  { %315 = vmatpush1.msra.mxu0 %v65_v54  ;;  %386 = vmatpush1.msra.mxu1 %v67_v55  ;;  %v217_v19 = vld [vmem:[#allocation2 + $0x520] sm:$0xff]  ;;  %v210_v20 = vld [vmem:[#allocation2 + $0x4e8] sm:$0xff]  ;;  %v212_v21 = vld [vmem:[#allocation2 + $0x4f8] sm:$0xff] }
  0x3a   :  { %316 = vmatprep.subr.mxu0 %v60_v56  ;;  %387 = vmatprep.subr.mxu1 %v62_v57  ;;  %v209_v22 = vld [vmem:[#allocation2 + $0x4e0] sm:$0xff]  ;;  %v211_v23 = vld [vmem:[#allocation2 + $0x4f0] sm:$0xff]  ;;  %v204_v24 = vld [vmem:[#allocation2 + $0x4b8] sm:$0xff] }
  0x3b   :  { %317 = vmatpush1.msra.mxu0 %v59_v58  ;;  %388 = vmatpush1.msra.mxu1 %v61_v59  ;;  %v206_v25 = vld [vmem:[#allocation2 + $0x4c8] sm:$0xff]  ;;  %v203_v26 = vld [vmem:[#allocation2 + $0x4b0] sm:$0xff]  ;;  %v205_v27 = vld [vmem:[#allocation2 + $0x4c0] sm:$0xff] }
  0x3c   :  { %318 = vmatprep.subr.mxu0 %v54_v60  ;;  %389 = vmatprep.subr.mxu1 %v56_v61  ;;  %v198_v28 = vld [vmem:[#allocation2 + $0x488] sm:$0xff]  ;;  %v200_v29 = vld [vmem:[#allocation2 + $0x498] sm:$0xff]  ;;  %v197_v30 = vld [vmem:[#allocation2 + $0x480] sm:$0xff] }
  0x3d   :  { %319 = vmatpush1.msra.mxu0 %v53_v62  ;;  %390 = vmatpush1.msra.mxu1 %v55_v63  ;;  %v199_v31 = vld [vmem:[#allocation2 + $0x490] sm:$0xff]  ;;  %v192_v32 = vld [vmem:[#allocation2 + $0x458] sm:$0xff]  ;;  %v194_v33 = vld [vmem:[#allocation2 + $0x468] sm:$0xff] }
  0x3e   :  { %320 = vmatprep.subr.mxu0 %v240_v0  ;;  %391 = vmatprep.subr.mxu1 %v242_v1  ;;  %v191_v34 = vld [vmem:[#allocation2 + $0x450] sm:$0xff]  ;;  %v193_v35 = vld [vmem:[#allocation2 + $0x460] sm:$0xff]  ;;  %v186_v36 = vld [vmem:[#allocation2 + $0x428] sm:$0xff] }
  0x3f   :  { %321 = vmatpush2.msra.mxu0 %v239_v2  ;;  %392 = vmatpush2.msra.mxu1 %v241_v3  ;;  %v188_v37 = vld [vmem:[#allocation2 + $0x438] sm:$0xff]  ;;  %v185_v38 = vld [vmem:[#allocation2 + $0x420] sm:$0xff]  ;;  %v187_v39 = vld [vmem:[#allocation2 + $0x430] sm:$0xff] }
  0x40   :  { %322 = vmatprep.subr.mxu0 %v234_v4  ;;  %393 = vmatprep.subr.mxu1 %v236_v5  ;;  %v180_v40 = vld [vmem:[#allocation2 + $0x3f8] sm:$0xff]  ;;  %v182_v41 = vld [vmem:[#allocation2 + $0x408] sm:$0xff]  ;;  %v179_v42 = vld [vmem:[#allocation2 + $0x3f0] sm:$0xff] }
  0x41   :  { %323 = vmatpush2.msra.mxu0 %v233_v6  ;;  %394 = vmatpush2.msra.mxu1 %v235_v7  ;;  %v181_v43 = vld [vmem:[#allocation2 + $0x400] sm:$0xff]  ;;  %v174_v44 = vld [vmem:[#allocation2 + $0x3c8] sm:$0xff]  ;;  %v176_v45 = vld [vmem:[#allocation2 + $0x3d8] sm:$0xff] }
  0x42   :  { %324 = vmatprep.subr.mxu0 %v228_v8  ;;  %395 = vmatprep.subr.mxu1 %v230_v9  ;;  %v173_v46 = vld [vmem:[#allocation2 + $0x3c0] sm:$0xff]  ;;  %v175_v47 = vld [vmem:[#allocation2 + $0x3d0] sm:$0xff]  ;;  %v168_v48 = vld [vmem:[#allocation2 + $0x398] sm:$0xff] }
  0x43   :  { %325 = vmatpush2.msra.mxu0 %v227_v10  ;;  %396 = vmatpush2.msra.mxu1 %v229_v11  ;;  %v170_v49 = vld [vmem:[#allocation2 + $0x3a8] sm:$0xff]  ;;  %v167_v50 = vld [vmem:[#allocation2 + $0x390] sm:$0xff]  ;;  %v169_v51 = vld [vmem:[#allocation2 + $0x3a0] sm:$0xff] }
  0x44   :  { %326 = vmatprep.subr.mxu0 %v222_v12  ;;  %397 = vmatprep.subr.mxu1 %v224_v13  ;;  %v162_v52 = vld [vmem:[#allocation2 + $0x368] sm:$0xff]  ;;  %v164_v53 = vld [vmem:[#allocation2 + $0x378] sm:$0xff]  ;;  %v161_v54 = vld [vmem:[#allocation2 + $0x360] sm:$0xff] }
  0x45   :  { %327 = vmatpush2.msra.mxu0 %v221_v14  ;;  %398 = vmatpush2.msra.mxu1 %v223_v15  ;;  %v163_v55 = vld [vmem:[#allocation2 + $0x370] sm:$0xff]  ;;  %v985_v56 = vld.sshfl [vmem:[%s1169_s0] sm:$0x33 pattern:$0x76325410]  ;;  %v156_v57 = vld [vmem:[#allocation2 + $0x338] sm:$0xff] }
  0x46   :  { %328 = vmatprep.subr.mxu0 %v216_v16  ;;  %399 = vmatprep.subr.mxu1 %v218_v17  ;;  %v158_v58 = vld [vmem:[#allocation2 + $0x348] sm:$0xff]  ;;  %v155_v59 = vld [vmem:[#allocation2 + $0x330] sm:$0xff]  ;;  %v157_v60 = vld [vmem:[#allocation2 + $0x340] sm:$0xff]  ;;  %v285_v63 = vcombine.high %v985_v56, %v985_v56 }
  0x47   :  { %329 = vmatpush2.msra.mxu0 %v215_v18  ;;  %400 = vmatpush2.msra.mxu1 %v217_v19  ;;  %v150_v61 = vld [vmem:[#allocation2 + $0x308] sm:$0xff]  ;;  %v152_v62 = vld [vmem:[#allocation2 + $0x318] sm:$0xff]  ;;  %v149_v0 = vld [vmem:[#allocation2 + $0x300] sm:$0xff] }
  0x48   :  { %330 = vmatprep.subr.mxu0 %v210_v20  ;;  %401 = vmatprep.subr.mxu1 %v212_v21  ;;  %v151_v1 = vld [vmem:[#allocation2 + $0x310] sm:$0xff]  ;;  %v534_v2 = vld [vmem:[#allocation5 + $0xf8] sm:$0xff]  ;;  %v532_v4 = vld [vmem:[#allocation5 + $0xe8] sm:$0xff] }
  0x49   :  { %331 = vmatpush2.msra.mxu0 %v209_v22  ;;  %402 = vmatpush2.msra.mxu1 %v211_v23  ;;  %v533_v3 = vld [vmem:[#allocation5 + $0xf0] sm:$0xff]  ;;  %v531_v5 = vld [vmem:[#allocation5 + $0xe0] sm:$0xff]  ;;  %v530_v6 = vld [vmem:[#allocation5 + $0xd8] sm:$0xff] }
  0x4a   :  { %332 = vmatprep.subr.mxu0 %v204_v24  ;;  %403 = vmatprep.subr.mxu1 %v206_v25  ;;  %v529_v7 = vld [vmem:[#allocation5 + $0xd0] sm:$0xff]  ;;  %v528_v8 = vld [vmem:[#allocation5 + $0xc8] sm:$0xff]  ;;  %v527_v9 = vld [vmem:[#allocation5 + $0xc0] sm:$0xff] }
  0x4b   :  { %333 = vmatpush2.msra.mxu0 %v203_v26  ;;  %404 = vmatpush2.msra.mxu1 %v205_v27  ;;  %v526_v10 = vld [vmem:[#allocation5 + $0xb8] sm:$0xff]  ;;  %v525_v11 = vld [vmem:[#allocation5 + $0xb0] sm:$0xff]  ;;  %v524_v12 = vld [vmem:[#allocation5 + $0xa8] sm:$0xff] }
  0x4c   :  { %334 = vmatprep.subr.mxu0 %v198_v28  ;;  %405 = vmatprep.subr.mxu1 %v200_v29  ;;  %v523_v13 = vld [vmem:[#allocation5 + $0xa0] sm:$0xff]  ;;  %v522_v14 = vld [vmem:[#allocation5 + $0x98] sm:$0xff]  ;;  %v521_v15 = vld [vmem:[#allocation5 + $0x90] sm:$0xff] }
  0x4d   :  { %335 = vmatpush2.msra.mxu0 %v197_v30  ;;  %406 = vmatpush2.msra.mxu1 %v199_v31  ;;  %v520_v16 = vld [vmem:[#allocation5 + $0x88] sm:$0xff]  ;;  %v519_v17 = vld [vmem:[#allocation5 + $0x80] sm:$0xff]  ;;  %v518_v18 = vld [vmem:[#allocation5 + $0x78] sm:$0xff] }
  0x4e   :  { %336 = vmatprep.subr.mxu0 %v192_v32  ;;  %407 = vmatprep.subr.mxu1 %v194_v33  ;;  %v517_v19 = vld [vmem:[#allocation5 + $0x70] sm:$0xff]  ;;  %v516_v20 = vld [vmem:[#allocation5 + $0x68] sm:$0xff]  ;;  %v515_v21 = vld [vmem:[#allocation5 + $0x60] sm:$0xff] }
  0x4f   :  { %337 = vmatpush2.msra.mxu0 %v191_v34  ;;  %408 = vmatpush2.msra.mxu1 %v193_v35  ;;  %v514_v22 = vld [vmem:[#allocation5 + $0x58] sm:$0xff]  ;;  %v513_v23 = vld [vmem:[#allocation5 + $0x50] sm:$0xff]  ;;  %v512_v24 = vld [vmem:[#allocation5 + $0x48] sm:$0xff] }
  0x50   :  { %338 = vmatprep.subr.mxu0 %v186_v36  ;;  %409 = vmatprep.subr.mxu1 %v188_v37  ;;  %v511_v25 = vld [vmem:[#allocation5 + $0x40] sm:$0xff]  ;;  %v510_v26 = vld [vmem:[#allocation5 + $0x38] sm:$0xff]  ;;  %v509_v27 = vld [vmem:[#allocation5 + $0x30] sm:$0xff] }
  0x51   :  { %339 = vmatpush2.msra.mxu0 %v185_v38  ;;  %410 = vmatpush2.msra.mxu1 %v187_v39  ;;  %v508_v28 = vld [vmem:[#allocation5 + $0x28] sm:$0xff]  ;;  %v507_v29 = vld [vmem:[#allocation5 + $0x20] sm:$0xff]  ;;  %v506_v30 = vld [vmem:[#allocation5 + $0x18] sm:$0xff] }
  0x52   :  { %340 = vmatprep.subr.mxu0 %v180_v40  ;;  %411 = vmatprep.subr.mxu1 %v182_v41  ;;  %v505_v31 = vld [vmem:[#allocation5 + $0x10] sm:$0xff]  ;;  %v504_v32 = vld [vmem:[#allocation5 + $0x8] sm:$0xff]  ;;  %v503_v33 = vld [vmem:[#allocation5] sm:$0xff] }
  0x53   :  { %341 = vmatpush2.msra.mxu0 %v179_v42  ;;  %412 = vmatpush2.msra.mxu1 %v181_v43  ;;  %v566_v34 = vld [vmem:[#allocation5 + $0x1f8] sm:$0xff]  ;;  %v565_v35 = vld [vmem:[#allocation5 + $0x1f0] sm:$0xff]  ;;  %v564_v36 = vld [vmem:[#allocation5 + $0x1e8] sm:$0xff] }
  0x54   :  { %342 = vmatprep.subr.mxu0 %v174_v44  ;;  %413 = vmatprep.subr.mxu1 %v176_v45  ;;  %v563_v37 = vld [vmem:[#allocation5 + $0x1e0] sm:$0xff]  ;;  %v562_v38 = vld [vmem:[#allocation5 + $0x1d8] sm:$0xff]  ;;  %v561_v39 = vld [vmem:[#allocation5 + $0x1d0] sm:$0xff] }
  0x55   :  { %343 = vmatpush2.msra.mxu0 %v173_v46  ;;  %414 = vmatpush2.msra.mxu1 %v175_v47  ;;  %v560_v40 = vld [vmem:[#allocation5 + $0x1c8] sm:$0xff]  ;;  %v559_v41 = vld [vmem:[#allocation5 + $0x1c0] sm:$0xff]  ;;  %v558_v42 = vld [vmem:[#allocation5 + $0x1b8] sm:$0xff] }
  0x56   :  { %344 = vmatprep.subr.mxu0 %v168_v48  ;;  %415 = vmatprep.subr.mxu1 %v170_v49  ;;  %v557_v43 = vld [vmem:[#allocation5 + $0x1b0] sm:$0xff]  ;;  %v556_v44 = vld [vmem:[#allocation5 + $0x1a8] sm:$0xff]  ;;  %v555_v45 = vld [vmem:[#allocation5 + $0x1a0] sm:$0xff] }
  0x57   :  { %345 = vmatpush2.msra.mxu0 %v167_v50  ;;  %416 = vmatpush2.msra.mxu1 %v169_v51  ;;  %v554_v46 = vld [vmem:[#allocation5 + $0x198] sm:$0xff]  ;;  %v553_v47 = vld [vmem:[#allocation5 + $0x190] sm:$0xff]  ;;  %v552_v48 = vld [vmem:[#allocation5 + $0x188] sm:$0xff] }
  0x58   :  { %346 = vmatprep.subr.mxu0 %v162_v52  ;;  %417 = vmatprep.subr.mxu1 %v164_v53  ;;  %v551_v49 = vld [vmem:[#allocation5 + $0x180] sm:$0xff]  ;;  %v550_v50 = vld [vmem:[#allocation5 + $0x178] sm:$0xff]  ;;  %v549_v51 = vld [vmem:[#allocation5 + $0x170] sm:$0xff] }
  0x59   :  { %347 = vmatpush2.msra.mxu0 %v161_v54  ;;  %418 = vmatpush2.msra.mxu1 %v163_v55  ;;  %v548_v52 = vld [vmem:[#allocation5 + $0x168] sm:$0xff]  ;;  %v547_v53 = vld [vmem:[#allocation5 + $0x160] sm:$0xff]  ;;  %v546_v54 = vld [vmem:[#allocation5 + $0x158] sm:$0xff] }
  0x5a   :  { %348 = vmatprep.subr.mxu0 %v156_v57  ;;  %419 = vmatprep.subr.mxu1 %v158_v58  ;;  %v545_v55 = vld [vmem:[#allocation5 + $0x150] sm:$0xff]  ;;  %v544_v57 = vld [vmem:[#allocation5 + $0x148] sm:$0xff]  ;;  %v543_v58 = vld [vmem:[#allocation5 + $0x140] sm:$0xff] }
  0x5b   :  { %349 = vmatpush2.msra.mxu0 %v155_v59  ;;  %420 = vmatpush2.msra.mxu1 %v157_v60  ;;  %v542_v59 = vld [vmem:[#allocation5 + $0x138] sm:$0xff]  ;;  %v541_v60 = vld [vmem:[#allocation5 + $0x130] sm:$0xff] }
  0x5c   :  { %350 = vmatprep.subr.mxu0 %v150_v61  ;;  %421 = vmatprep.subr.mxu1 %v152_v62  ;;  %v540_v61 = vld [vmem:[#allocation5 + $0x128] sm:$0xff]  ;;  %v539_v62 = vld [vmem:[#allocation5 + $0x120] sm:$0xff] }
  0x5d   :  { %351 = vmatpush2.msra.mxu0 %v149_v0  ;;  %352 = vmatprep.mubr.f32.mxu0 %v285_v63  ;;  %v537_v0 = vld [vmem:[#allocation5 + $0x110] sm:$0xff] }
  0x5e   :  { %422 = vmatpush2.msra.mxu1 %v151_v1  ;;  %423 = vmatprep.mubr.f32.mxu1 %v285_v63  ;;  %v536_v1 = vld [vmem:[#allocation5 + $0x108] sm:$0xff] }
  0x5f   :  { %353 = vmatmul.mubr.f32.vlgmr.msra.gmra.mxu0 %v985_v56  ;;  %424 = vmatmul.mubr.f32.vlgmr.msra.gmra.mxu1 %v985_v56 }
  0x60   :  { %567 = vmatprep.subr.mxu1 %v534_v2  ;;  %494 = vmatprep.mubr.f32.mxu0 %v285_v63  ;;  %v538_v63 = vld [vmem:[#allocation5 + $0x118] sm:$0xff]  ;;  %v535_v2 = vld [vmem:[#allocation5 + $0x100] sm:$0xff] }
  0x61   :  { %568 = vmatpush1.msra.mxu1 %v533_v3  ;;  %v247_v3 = vlaneseq }
  0x62   :  { %569 = vmatprep.subr.mxu1 %v532_v4 }
  0x63   :  { %570 = vmatpush1.msra.mxu1 %v531_v5  ;;  %v991_v4 = vshrl.u32 %v247_v3, 7 }
  0x64   :  { %571 = vmatprep.subr.mxu1 %v530_v6 }
  0x65   :  { %572 = vmatpush1.msra.mxu1 %v529_v7  ;;  %v249_v5 = vsub.s32 0, %v991_v4  ;;  %v257_v6 = vsub.s32 2, %v991_v4  ;;  %v998_v7 = vld [vmem:[%s1171_s2] sm:$0x3f]  ;;  %s938_s2 = smov 32  }
  0x66   :  { %573 = vmatprep.subr.mxu1 %v528_v8  ;;  %v253_v8 = vsub.s32 1, %v991_v4 }
  0x67   :  { %574 = vmatpush1.msra.mxu1 %v527_v9  ;;  %v261_v9 = vsub.s32 3, %v991_v4 }
  0x68   :  { %575 = vmatprep.subr.mxu1 %v526_v10  ;;  %v250_v10 = vrot.slane %v998_v7, %v249_v5  ;;  %v238_v5 = vld [vmem:[#allocation2 + $0x5c8] sm:$0xff] }
  0x69   :  { %576 = vmatpush1.msra.mxu1 %v525_v11  ;;  %v258_v11 = vrot.slane %v998_v7, %v257_v6  ;;  %v237_v6 = vld [vmem:[#allocation2 + $0x5c0] sm:$0xff] }
  0x6a   :  { %577 = vmatprep.subr.mxu1 %v524_v12  ;;  %v254_v12 = vrot.slane %v998_v7, %v253_v8  ;;  %v232_v8 = vld [vmem:[#allocation2 + $0x598] sm:$0xff] }
  0x6b   :  { %578 = vmatpush1.msra.mxu1 %v523_v13  ;;  %v262_v13 = vrot.slane %v998_v7, %v261_v9  ;;  %v231_v9 = vld [vmem:[#allocation2 + $0x590] sm:$0xff] }
  0x6c   :  { %579 = vmatprep.subr.mxu1 %v522_v14 }
  0x6d   :  { %580 = vmatpush1.msra.mxu1 %v521_v15 }
  0x6e   :  { %581 = vmatprep.subr.mxu1 %v520_v16 }
  0x6f   :  { %582 = vmatpush1.msra.mxu1 %v519_v17 }
  0x70   :  { %583 = vmatprep.subr.mxu1 %v518_v18 }
  0x71   :  { %584 = vmatpush1.msra.mxu1 %v517_v19 }
  0x72   :  { %585 = vmatprep.subr.mxu1 %v516_v20 }
  0x73   :  { %586 = vmatpush1.msra.mxu1 %v515_v21 }
  0x74   :  { %587 = vmatprep.subr.mxu1 %v514_v22 }
  0x75   :  { %588 = vmatpush1.msra.mxu1 %v513_v23 }
  0x76   :  { %589 = vmatprep.subr.mxu1 %v512_v24 }
  0x77   :  { %590 = vmatpush1.msra.mxu1 %v511_v25 }
  0x78   :  { %591 = vmatprep.subr.mxu1 %v510_v26  ;;  %v1014_v26 = vand.u32 127, %v247_v3  ;;  %v243_v3 = vld [vmem:[#allocation2 + $0x5f0] sm:$0xff] }
  0x79   :  { %592 = vmatpush1.msra.mxu1 %v509_v27 }
  0x7a   :  { %593 = vmatprep.subr.mxu1 %v508_v28  ;;  %vm644_vm0 = vcmp.lt.s32.totalorder %v1014_v26, 32  ;;  %vm653_vm1 = vcmp.lt.s32.totalorder %v1014_v26, 64 }
  0x7b   :  { %594 = vmatpush1.msra.mxu1 %v507_v29 }
  0x7c   :  { %595 = vmatprep.subr.mxu1 %v506_v30 }
  0x7d   :  { %596 = vmatpush1.msra.mxu1 %v505_v31 }
  0x7e   :  { %597 = vmatprep.subr.mxu1 %v504_v32  ;;  %v148_v32 = vld [vmem:[#allocation2 + $0x2f8] sm:$0xff] }
  0x7f   :  { %598 = vmatpush1.msra.mxu1 %v503_v33  ;;  %v147_v33 = vld [vmem:[#allocation2 + $0x2f0] sm:$0xff]  ;;  %430 = vmatprep.subr.mxu0 %v148_v32  ;;  %v172_v32 = vld [vmem:[#allocation2 + $0x3b8] sm:$0xff] }
  0x80   :  { %599 = vmatprep.subr.mxu1 %v566_v34  ;;  %v142_v34 = vld [vmem:[#allocation2 + $0x2c8] sm:$0xff]  ;;  %431 = vmatpush1.msra.mxu0 %v147_v33  ;;  %v171_v33 = vld [vmem:[#allocation2 + $0x3b0] sm:$0xff] }
  0x81   :  { %600 = vmatpush2.msra.mxu1 %v565_v35  ;;  %432 = vmatprep.subr.mxu0 %v142_v34  ;;  %v166_v34 = vld [vmem:[#allocation2 + $0x388] sm:$0xff] }
  0x82   :  { %601 = vmatprep.subr.mxu1 %v564_v36  ;;  %v141_v36 = vld [vmem:[#allocation2 + $0x2c0] sm:$0xff] }
  0x83   :  { %602 = vmatpush2.msra.mxu1 %v563_v37  ;;  %v136_v37 = vld [vmem:[#allocation2 + $0x298] sm:$0xff]  ;;  %433 = vmatpush1.msra.mxu0 %v141_v36  ;;  %v165_v36 = vld [vmem:[#allocation2 + $0x380] sm:$0xff] }
  0x84   :  { %603 = vmatprep.subr.mxu1 %v562_v38  ;;  %v135_v38 = vld [vmem:[#allocation2 + $0x290] sm:$0xff]  ;;  %434 = vmatprep.subr.mxu0 %v136_v37  ;;  %v160_v37 = vld [vmem:[#allocation2 + $0x358] sm:$0xff] }
  0x85   :  { %604 = vmatpush2.msra.mxu1 %v561_v39  ;;  %v130_v39 = vld [vmem:[#allocation2 + $0x268] sm:$0xff]  ;;  %435 = vmatpush1.msra.mxu0 %v135_v38  ;;  %v159_v38 = vld [vmem:[#allocation2 + $0x350] sm:$0xff] }
  0x86   :  { %605 = vmatprep.subr.mxu1 %v560_v40  ;;  %v129_v40 = vld [vmem:[#allocation2 + $0x260] sm:$0xff]  ;;  %436 = vmatprep.subr.mxu0 %v130_v39  ;;  %v154_v39 = vld [vmem:[#allocation2 + $0x328] sm:$0xff] }
  0x87   :  { %606 = vmatpush2.msra.mxu1 %v559_v41  ;;  %v124_v41 = vld [vmem:[#allocation2 + $0x238] sm:$0xff]  ;;  %437 = vmatpush1.msra.mxu0 %v129_v40  ;;  %v153_v40 = vld [vmem:[#allocation2 + $0x320] sm:$0xff] }
  0x88   :  { %607 = vmatprep.subr.mxu1 %v558_v42  ;;  %v123_v42 = vld [vmem:[#allocation2 + $0x230] sm:$0xff]  ;;  %438 = vmatprep.subr.mxu0 %v124_v41 }
  0x89   :  { %608 = vmatpush2.msra.mxu1 %v557_v43  ;;  %439 = vmatpush1.msra.mxu0 %v123_v42  ;;  %v118_v43 = vld [vmem:[#allocation2 + $0x208] sm:$0xff] }
  0x8a   :  { %609 = vmatprep.subr.mxu1 %v556_v44  ;;  %v117_v44 = vld [vmem:[#allocation2 + $0x200] sm:$0xff]  ;;  %440 = vmatprep.subr.mxu0 %v118_v43 }
  0x8b   :  { %610 = vmatpush2.msra.mxu1 %v555_v45  ;;  %v112_v45 = vld [vmem:[#allocation2 + $0x1d8] sm:$0xff]  ;;  %441 = vmatpush1.msra.mxu0 %v117_v44 }
  0x8c   :  { %611 = vmatprep.subr.mxu1 %v554_v46  ;;  %v111_v46 = vld [vmem:[#allocation2 + $0x1d0] sm:$0xff]  ;;  %442 = vmatprep.subr.mxu0 %v112_v45 }
  0x8d   :  { %612 = vmatpush2.msra.mxu1 %v553_v47  ;;  %v106_v47 = vld [vmem:[#allocation2 + $0x1a8] sm:$0xff]  ;;  %443 = vmatpush1.msra.mxu0 %v111_v46 }
  0x8e   :  { %613 = vmatprep.subr.mxu1 %v552_v48  ;;  %v105_v48 = vld [vmem:[#allocation2 + $0x1a0] sm:$0xff]  ;;  %444 = vmatprep.subr.mxu0 %v106_v47 }
  0x8f   :  { %614 = vmatpush2.msra.mxu1 %v551_v49  ;;  %v100_v49 = vld [vmem:[#allocation2 + $0x178] sm:$0xff]  ;;  %445 = vmatpush1.msra.mxu0 %v105_v48 }
  0x90   :  { %615 = vmatprep.subr.mxu1 %v550_v50  ;;  %v99_v50 = vld [vmem:[#allocation2 + $0x170] sm:$0xff]  ;;  %446 = vmatprep.subr.mxu0 %v100_v49 }
  0x91   :  { %616 = vmatpush2.msra.mxu1 %v549_v51  ;;  %v94_v51 = vld [vmem:[#allocation2 + $0x148] sm:$0xff]  ;;  %447 = vmatpush1.msra.mxu0 %v99_v50 }
  0x92   :  { %617 = vmatprep.subr.mxu1 %v548_v52  ;;  %v93_v52 = vld [vmem:[#allocation2 + $0x140] sm:$0xff]  ;;  %448 = vmatprep.subr.mxu0 %v94_v51  ;;  %v718_v51 = vld [vmem:[%s1173_s4 + $0xf8] sm:$0xff] }
  0x93   :  { %618 = vmatpush2.msra.mxu1 %v547_v53  ;;  %v88_v53 = vld [vmem:[#allocation2 + $0x118] sm:$0xff]  ;;  %449 = vmatpush1.msra.mxu0 %v93_v52 }
  0x94   :  { %619 = vmatprep.subr.mxu1 %v546_v54  ;;  %v87_v54 = vld [vmem:[#allocation2 + $0x110] sm:$0xff]  ;;  %450 = vmatprep.subr.mxu0 %v88_v53  ;;  %v702_v52 = vld [vmem:[%s1173_s4 + $0x78] sm:$0xff]  ;;  %v715_v53 = vld [vmem:[%s1173_s4 + $0xe0] sm:$0xff] }
  0x95   :  { %620 = vmatpush2.msra.mxu1 %v545_v55  ;;  %v82_v55 = vld [vmem:[#allocation2 + $0xe8] sm:$0xff]  ;;  %451 = vmatpush1.msra.mxu0 %v87_v54  ;;  %v699_v54 = vld [vmem:[%s1173_s4 + $0x60] sm:$0xff] }
  0x96   :  { %621 = vmatprep.subr.mxu1 %v544_v57  ;;  %v81_v57 = vld [vmem:[#allocation2 + $0xe0] sm:$0xff]  ;;  %452 = vmatprep.subr.mxu0 %v82_v55 }
  0x97   :  { %622 = vmatpush2.msra.mxu1 %v543_v58  ;;  %v76_v58 = vld [vmem:[#allocation2 + $0xb8] sm:$0xff]  ;;  %453 = vmatpush1.msra.mxu0 %v81_v57 }
  0x98   :  { %623 = vmatprep.subr.mxu1 %v542_v59  ;;  %v75_v59 = vld [vmem:[#allocation2 + $0xb0] sm:$0xff]  ;;  %454 = vmatprep.subr.mxu0 %v76_v58  ;;  %v714_v58 = vld [vmem:[%s1173_s4 + $0xd8] sm:$0xff] }
  0x99   :  { %624 = vmatpush2.msra.mxu1 %v541_v60  ;;  %v70_v60 = vld [vmem:[#allocation2 + $0x88] sm:$0xff]  ;;  %455 = vmatpush1.msra.mxu0 %v75_v59  ;;  %v698_v59 = vld [vmem:[%s1173_s4 + $0x58] sm:$0xff] }
  0x9a   :  { %625 = vmatprep.subr.mxu1 %v540_v61  ;;  %v69_v61 = vld [vmem:[#allocation2 + $0x80] sm:$0xff]  ;;  %456 = vmatprep.subr.mxu0 %v70_v60  ;;  %v713_v60 = vld [vmem:[%s1173_s4 + $0xd0] sm:$0xff] }
  0x9b   :  { %626 = vmatpush2.msra.mxu1 %v539_v62  ;;  %v64_v62 = vld [vmem:[#allocation2 + $0x58] sm:$0xff]  ;;  %457 = vmatpush1.msra.mxu0 %v69_v61  ;;  %v697_v61 = vld [vmem:[%s1173_s4 + $0x50] sm:$0xff] }
  0x9c   :  { %627 = vmatprep.subr.mxu1 %v538_v63  ;;  %v63_v63 = vld [vmem:[#allocation2 + $0x50] sm:$0xff]  ;;  %458 = vmatprep.subr.mxu0 %v64_v62  ;;  %v712_v62 = vld [vmem:[%s1173_s4 + $0xc8] sm:$0xff] }
  0x9d   :  { %628 = vmatpush2.msra.mxu1 %v537_v0  ;;  %v58_v0 = vld [vmem:[#allocation2 + $0x28] sm:$0xff]  ;;  %459 = vmatpush1.msra.mxu0 %v63_v63 }
  0x9e   :  { %629 = vmatprep.subr.mxu1 %v536_v1  ;;  %v57_v1 = vld [vmem:[#allocation2 + $0x20] sm:$0xff]  ;;  %460 = vmatprep.subr.mxu0 %v58_v0  ;;  %v696_v63 = vld [vmem:[%s1173_s4 + $0x48] sm:$0xff] }
  0x9f   :  { %630 = vmatpush2.msra.mxu1 %v535_v2  ;;  %v244_v2 = vld [vmem:[#allocation2 + $0x5f8] sm:$0xff]  ;;  %461 = vmatpush1.msra.mxu0 %v57_v1  ;;  %v711_v0 = vld [vmem:[%s1173_s4 + $0xc0] sm:$0xff] }
  0xa0   :  { %462 = vmatprep.subr.mxu0 %v244_v2  ;;  %v695_v1 = vld [vmem:[%s1173_s4 + $0x40] sm:$0xff]  ;;  %v710_v2 = vld [vmem:[%s1173_s4 + $0xb8] sm:$0xff] }
  0xa1   :  { %463 = vmatpush2.msra.mxu0 %v243_v3  ;;  %v694_v3 = vld [vmem:[%s1173_s4 + $0x38] sm:$0xff] }
  0xa2   :  { %464 = vmatprep.subr.mxu0 %v238_v5  ;;  %v709_v5 = vld [vmem:[%s1173_s4 + $0xb0] sm:$0xff] }
  0xa3   :  { %465 = vmatpush2.msra.mxu0 %v237_v6 }
  0xa4   :  { %466 = vmatprep.subr.mxu0 %v232_v8  ;;  %v693_v8 = vld [vmem:[%s1173_s4 + $0x30] sm:$0xff] }
  0xa5   :  { %467 = vmatpush2.msra.mxu0 %v231_v9 }
 0x11f   :  { %v354_v14 = vpop.f32.mrf.mxu0  ;;  %v425_v15 = vpop.f32.mrf.mxu1 }
 0x120   :  { %v355_v16 = vadd.f32 %v354_v14, %v250_v10  ;;  %v426_v17 = vadd.f32 %v425_v15, %v258_v11  ;;  %v226_v10 = vld [vmem:[#allocation2 + $0x568] sm:$0xff]  ;;  %v225_v11 = vld [vmem:[#allocation2 + $0x560] sm:$0xff] }
 0x121   :  { %v356_v18 = vpop.f32.mrf.mxu0  ;;  %v427_v19 = vpop.f32.mrf.mxu1  ;;  %468 = vmatprep.subr.mxu0 %v226_v10  ;;  %v214_v14 = vld [vmem:[#allocation2 + $0x508] sm:$0xff]  ;;  %v213_v15 = vld [vmem:[#allocation2 + $0x500] sm:$0xff] }
 0x122   :  { %v357_v20 = vadd.f32 %v356_v18, %v254_v12  ;;  %v428_v21 = vadd.f32 %v427_v19, %v262_v13  ;;  %v501_v23 = vmul.f32 %v426_v17, %v355_v16  ;;  %v220_v12 = vld [vmem:[#allocation2 + $0x538] sm:$0xff]  ;;  %v219_v13 = vld [vmem:[#allocation2 + $0x530] sm:$0xff]  ;;  %469 = vmatpush2.msra.mxu0 %v225_v11  ;;  %v202_v18 = vld [vmem:[#allocation2 + $0x4a8] sm:$0xff] }
 0x123   :  { %470 = vmatprep.subr.mxu0 %v220_v12  ;;  %v208_v16 = vld [vmem:[#allocation2 + $0x4d8] sm:$0xff]  ;;  %v207_v17 = vld [vmem:[#allocation2 + $0x4d0] sm:$0xff]  ;;  %v201_v19 = vld [vmem:[#allocation2 + $0x4a0] sm:$0xff] }
 0x124   :  { %v502_v22 = vmul.f32 %v428_v21, %v357_v20  ;;  %471 = vmatpush2.msra.mxu0 %v219_v13  ;;  %v196_v20 = vld [vmem:[#allocation2 + $0x478] sm:$0xff]  ;;  %v195_v21 = vld [vmem:[#allocation2 + $0x470] sm:$0xff]  ;;  %v708_v10 = vld [vmem:[%s1173_s4 + $0xa8] sm:$0xff] }
 0x125   :  { %472 = vmatprep.subr.mxu0 %v214_v14 }
 0x126   :  { %631 = vmatprep.mubr.f32.mxu1 %v502_v22  ;;  %473 = vmatpush2.msra.mxu0 %v213_v15  ;;  %v190_v22 = vld [vmem:[#allocation2 + $0x448] sm:$0xff] }
 0x127   :  { %632 = vmatmul.mubr.f32.vlgmr.msra.gmra.mxu1 %v501_v23  ;;  %474 = vmatprep.subr.mxu0 %v208_v16  ;;  %v189_v23 = vld [vmem:[#allocation2 + $0x440] sm:$0xff]  ;;  %v692_v15 = vld [vmem:[%s1173_s4 + $0x28] sm:$0xff] }
 0x128   :  { %475 = vmatpush2.msra.mxu0 %v207_v17  ;;  %v707_v16 = vld [vmem:[%s1173_s4 + $0xa0] sm:$0xff] }
 0x129   :  { %476 = vmatprep.subr.mxu0 %v202_v18  ;;  %v691_v17 = vld [vmem:[%s1173_s4 + $0x20] sm:$0xff]  ;;  %v706_v18 = vld [vmem:[%s1173_s4 + $0x98] sm:$0xff] }
 0x12a   :  { %477 = vmatpush2.msra.mxu0 %v201_v19  ;;  %v690_v19 = vld [vmem:[%s1173_s4 + $0x18] sm:$0xff] }
 0x12b   :  { %478 = vmatprep.subr.mxu0 %v196_v20  ;;  %v705_v20 = vld [vmem:[%s1173_s4 + $0x90] sm:$0xff] }
 0x12c   :  { %479 = vmatpush2.msra.mxu0 %v195_v21  ;;  %v689_v21 = vld [vmem:[%s1173_s4 + $0x10] sm:$0xff] }
 0x12d   :  { %480 = vmatprep.subr.mxu0 %v190_v22  ;;  %v704_v22 = vld [vmem:[%s1173_s4 + $0x88] sm:$0xff] }
 0x12e   :  { %481 = vmatpush2.msra.mxu0 %v189_v23  ;;  %v688_v23 = vld [vmem:[%s1173_s4 + $0x8] sm:$0xff] }
 0x1e7   :  { %v1006_v24 = vpop.f32.mrf.mxu1 }
 0x1e8   :  { %638 = vrot.lane.b32.xlu0 %v1006_v24, %s938_s2 }
 0x1e9   :  { %v1010_v25 = vpop.f32.mrf.mxu1 }
 0x1ec   :  { %640 = vrot.lane.b32.xlu0 %v1010_v25, %s938_s2 }
 0x25a   :  { %v639_v27 = vpop.permute.xlu0 %638 }
 0x25e   :  { %v641_v28 = vpop.permute.xlu0 %640 }
 0x25f   :  { %v646_v29 = vsel %vm644_vm0, %v641_v28, %v639_v27  ;;  %v645_v31 = vsel %vm644_vm0, %v639_v27, %v641_v28  ;;  %v184_v27 = vld [vmem:[#allocation2 + $0x418] sm:$0xff]  ;;  %v183_v28 = vld [vmem:[#allocation2 + $0x410] sm:$0xff] }
 0x260   :  { %v1020_v30 = vmax.f32 %v1006_v24, %v646_v29  ;;  %v1027_v35 = vmax.f32 %v1010_v25, %v645_v31  ;;  %v178_v29 = vld [vmem:[#allocation2 + $0x3e8] sm:$0xff]  ;;  %482 = vmatprep.subr.mxu0 %v184_v27  ;;  %v177_v31 = vld [vmem:[#allocation2 + $0x3e0] sm:$0xff] }
 0x261   :  { %483 = vmatpush2.msra.mxu0 %v183_v28  ;;  %v703_v27 = vld [vmem:[%s1173_s4 + $0x80] sm:$0xff] }
 0x262   :  { %649 = vrot.lane.b32.xlu1 %v1020_v30, %s939_s12  ;;  %484 = vmatprep.subr.mxu0 %v178_v29  ;;  %v687_v28 = vld [vmem:[%s1173_s4] sm:$0xff] }
 0x263   :  { %485 = vmatpush2.msra.mxu0 %v177_v31 }
 0x264   :  { %486 = vmatprep.subr.mxu0 %v172_v32 }
 0x265   :  { %487 = vmatpush2.msra.mxu0 %v171_v33 }
 0x266   :  { %651 = vrot.lane.b32.xlu1 %v1027_v35, %s939_s12  ;;  %488 = vmatprep.subr.mxu0 %v166_v34 }
 0x267   :  { %489 = vmatpush2.msra.mxu0 %v165_v36 }
 0x268   :  { %490 = vmatprep.subr.mxu0 %v160_v37 }
 0x269   :  { %491 = vmatpush2.msra.mxu0 %v159_v38  ;;  %v265_v38 = vsub.s32 4, %v991_v4 }
 0x26a   :  { %492 = vmatprep.subr.mxu0 %v154_v39  ;;  %v269_v39 = vsub.s32 5, %v991_v4  ;;  %v815_v4 = vld [vmem:[%s1174_s5] ss:$0 sm:$0xff] }
 0x26b   :  { %493 = vmatpush2.msra.mxu0 %v153_v40 }
 0x26c   :  { %495 = vmatmul.mubr.f32.vlgmr.msra.gmra.mxu0 %v985_v56  ;;  %816 = vmatprep.subr.mxu0 %v718_v51 }
 0x26d   :  { %817 = vmatpush3.msra.mxu0 %v702_v52 }
 0x2d4   :  { %v650_v41 = vpop.permute.xlu1 %649 }
 0x2d8   :  { %v652_v42 = vpop.permute.xlu1 %651 }
 0x2d9   :  { %v654_v43 = vsel %vm653_vm1, %v650_v41, %v652_v42  ;;  %v655_v44 = vsel %vm653_vm1, %v652_v42, %v650_v41  ;;  %v266_v41 = vrot.slane %v998_v7, %v265_v38  ;;  %v270_v42 = vrot.slane %v998_v7, %v269_v39 }
 0x2da   :  { %v656_v45 = vmax.f32 %v1020_v30, %v655_v44  ;;  %v657_v46 = vmax.f32 %v1027_v35, %v654_v43  ;;  %v717_v30 = vld [vmem:[%s1173_s4 + $0xf0] sm:$0xff]  ;;  %v700_v35 = vld [vmem:[%s1173_s4 + $0x68] sm:$0xff] }
 0x2db   :  { %818 = vmatprep.subr.mxu0 %v717_v30 }
 0x2dc   :  { %v658_v47 = vmax.f32 %v656_v45, %v657_v46 }
 0x2de   :  { %v659_v48 = vsub.f32 %v1006_v24, %v658_v47  ;;  %v660_v49 = vsub.f32 %v1010_v25, %v658_v47  ;;  %v701_v24 = vld [vmem:[%s1173_s4 + $0x70] sm:$0xff]  ;;  %v716_v25 = vld [vmem:[%s1173_s4 + $0xe8] sm:$0xff] }
 0x2df   :  { %819 = vmatpush3.msra.mxu0 %v701_v24 }
 0x2e0   :  { %v661_v56 = vmul.f32 1.442695, %v659_v48  ;;  %v663_v50 = vmul.f32 1.442695, %v660_v49  ;;  %820 = vmatprep.subr.mxu0 %v716_v25 }
 0x2e1   :  { %821 = vmatpush3.msra.mxu0 %v700_v35 }
 0x2e2   :  { %860 = vpow2.f32 %v661_v56  ;;  %822 = vmatprep.subr.mxu0 %v715_v53 }
 0x2e3   :  { %862 = vpow2.f32 %v663_v50  ;;  %823 = vmatpush3.msra.mxu0 %v699_v54 }
 0x2e4   :  { %824 = vmatprep.subr.mxu0 %v714_v58 }
 0x2e5   :  { %825 = vmatpush3.msra.mxu0 %v698_v59 }
 0x2e6   :  { %826 = vmatprep.subr.mxu0 %v713_v60 }
 0x2e7   :  { %827 = vmatpush3.msra.mxu0 %v697_v61 }
 0x2e8   :  { %828 = vmatprep.subr.mxu0 %v712_v62 }
 0x2e9   :  { %829 = vmatpush3.msra.mxu0 %v696_v63 }
 0x2ea   :  { %830 = vmatprep.subr.mxu0 %v711_v0 }
 0x2eb   :  { %831 = vmatpush3.msra.mxu0 %v695_v1 }
 0x2ec   :  { %832 = vmatprep.subr.mxu0 %v710_v2 }
 0x2ed   :  { %833 = vmatpush3.msra.mxu0 %v694_v3 }
 0x2ee   :  { %834 = vmatprep.subr.mxu0 %v709_v5 }
 0x2ef   :  { %v1065_v55 = vpop.eup %860  ;;  %835 = vmatpush3.msra.mxu0 %v693_v8 }
 0x2f0   :  { %v1067_v57 = vpop.eup %862  ;;  %665 = vrot.lane.b32.xlu0 %v1065_v55, %s938_s2  ;;  %836 = vmatprep.subr.mxu0 %v708_v10 }
 0x2f1   :  { %667 = vrot.lane.b32.xlu1 %v1067_v57, %s938_s2  ;;  %837 = vmatpush3.msra.mxu0 %v692_v15 }
 0x2f2   :  { %838 = vmatprep.subr.mxu0 %v707_v16 }
 0x2f3   :  { %839 = vmatpush3.msra.mxu0 %v691_v17 }
 0x2f4   :  { %840 = vmatprep.subr.mxu0 %v706_v18 }
 0x2f5   :  { %841 = vmatpush3.msra.mxu0 %v690_v19 }
 0x2f6   :  { %842 = vmatprep.subr.mxu0 %v705_v20 }
 0x2f7   :  { %843 = vmatpush3.msra.mxu0 %v689_v21 }
 0x2f8   :  { %844 = vmatprep.subr.mxu0 %v704_v22 }
 0x2f9   :  { %845 = vmatpush3.msra.mxu0 %v688_v23 }
 0x2fa   :  { %846 = vmatprep.subr.mxu0 %v703_v27 }
 0x2fb   :  { %847 = vmatpush3.msra.mxu0 %v687_v28 }
 0x32c   :  { %v496_v40 = vpop.f32.mrf.mxu0 }
 0x32d   :  { %v497_v45 = vadd.f32 %v496_v40, %v266_v41 }
 0x32e   :  { %v498_v43 = vpop.f32.mrf.mxu0 }
 0x32f   :  { %v499_v26 = vadd.f32 %v498_v43, %v270_v42 }
 0x362   :  { %v666_v6 = vpop.permute.xlu0 %665 }
 0x363   :  { %v668_v9 = vpop.permute.xlu1 %667 }
 0x364   :  { %v669_v11 = vsel %vm644_vm0, %v666_v6, %v668_v9  ;;  %v670_v12 = vsel %vm644_vm0, %v668_v9, %v666_v6 }
 0x365   :  { %v671_v13 = vadd.f32 %v1065_v55, %v670_v12  ;;  %v672_v14 = vadd.f32 %v1067_v57, %v669_v11 }
 0x367   :  { %673 = vrot.lane.b32.xlu0 %v671_v13, %s939_s12  ;;  %675 = vrot.lane.b32.xlu1 %v672_v14, %s939_s12 }
 0x3d9   :  { %v674_v29 = vpop.permute.xlu0 %673  ;;  %v676_v31 = vpop.permute.xlu1 %675 }
 0x3da   :  { %v677_v32 = vsel %vm653_vm1, %v674_v29, %v676_v31  ;;  %v678_v33 = vsel %vm653_vm1, %v676_v31, %v674_v29 }
 0x3db   :  { %v679_v34 = vadd.f32 %v678_v33, %v671_v13  ;;  %v680_v36 = vadd.f32 %v677_v32, %v672_v14 }
 0x3dd   :  { %v681_v37 = vadd.f32 %v680_v36, %v679_v34 }
 0x3df   :  { %864 = vrcp.f32 %v681_v37 }
 0x3ec   :  { %v865_v44 = vpop.eup %864 }
 0x3ed   :  { %v683_v46 = vmul.f32 %v865_v44, %v1065_v55  ;;  %v684_v47 = vmul.f32 %v865_v44, %v1067_v57 }
 0x3ef   :  { %v685_v48 = vmul.f32 %v683_v46, %v497_v45  ;;  %v686_v49 = vmul.f32 %v684_v47, %v499_v26 }
 0x3f1   :  { %790 = vmatprep.mubr.f32.mxu0 %v686_v49 }
 0x3f2   :  { %791 = vmatmul.mubr.f32.vlgmr.msra.gmra.mxu0 %v685_v48 }
 0x4b2   :  { %v848_v56 = vpop.f32.mrf.mxu0 }
 0x4b4   :  { %v849_v50 = vpop.f32.mrf.mxu0 }
 0x4b5   :  { %v850_v7 = vadd.f32 %v849_v50, %v848_v56 }
 0x4b7   :  { %v793_v51 = vadd.f32 %v850_v7, %v815_v4 }
 0x4b9   :  { %797 = vst.msk [vmem:[#allocation7] sm:$0x3] %vm796_vm2, %v793_v51 }
 0x4ba   :  { %917 = shalt.err (!%p914_p0)
}
 0x4bb   :  { %807 = dma.vmem_to_hbm [thread:$0]  %s805_s24, 32, %s1175_s6, [#allocation4]  }
 0x4bc   :  { %930 = dma.done.wait [#allocation4], 32  }
 0x4bd   :  { %931 = vsyncadd [#allocation4], 4294967264 }
 0x4be   :  { %811 = vsyncpa [#allocation3], 1 }
 0x4bf   :  { %812 = vsyncpa [#allocation6], 1 }
 0x4c0   :  { %813 = vsyncpa [#allocation4], 1 }

</bundles_post_ra>
